<compile_context>
chip_gen: v7x
topology: tpu7x:2x2x1
jax: 0.10.0
libtpu: 0.0.40
codegen_flags: <defaults>
</compile_context>

<pallas_src>
import jax
import jax.numpy as jnp
from jax.experimental import pallas as pl
from jax.experimental.pallas import tpu as pltpu


def _linear_kernel(x_ref, w_ref, b_ref, o_ref):
    # Whole arrays live in VMEM; shapes are tiny, single invocation.
    x = x_ref[...]  # (N, K) f32
    w = w_ref[...]  # (K, M) f32
    b = b_ref[...]  # (1, M) f32

    n, k = x.shape
    m = w.shape[1]

    # VPU-only formulation: start from the broadcast bias and accumulate an
    # unrolled rank-1 update per input feature (K is a static Python int = 5),
    # so there is no MXU dispatch and no MXU result-FIFO drain.
    acc = jnp.broadcast_to(b.astype(jnp.float32), (n, m))
    for kk in range(k):
        xk = x[:, kk].astype(jnp.float32)[:, None]   # (N, 1)
        wk = w[kk, :].astype(jnp.float32)[None, :]   # (1, M)
        acc = acc + xk * wk

    o_ref[...] = acc.astype(o_ref.dtype)


def linear(x, weight, bias):
    """y = x @ weight + bias.

    x:      (N, K) float32
    weight: (K, M) float32   (transposed relative to torch's nn.Linear.weight)
    bias:   (M,)   float32
    """
    N, K = x.shape
    K2, M = weight.shape
    assert K == K2
    bias2d = bias.reshape(1, M)

    return pl.pallas_call(
        _linear_kernel,
        out_shape=jax.ShapeDtypeStruct((N, M), x.dtype),
        # No grid: whole arrays as single VMEM blocks -> no grid-step overhead.
        in_specs=[
            pl.BlockSpec(memory_space=pltpu.MemorySpace.VMEM),
            pl.BlockSpec(memory_space=pltpu.MemorySpace.VMEM),
            pl.BlockSpec(memory_space=pltpu.MemorySpace.VMEM),
        ],
        out_specs=pl.BlockSpec(memory_space=pltpu.MemorySpace.VMEM),
    )(x, weight, bias2d)


if __name__ == "__main__":
    key = jax.random.PRNGKey(0)
    k_x, k_w, k_b = jax.random.split(key, 3)

    in_features, out_features = 5, 3
    batch = 10  # matches M.get_example_inputs(): torch.rand(10, 5)

    # Deterministic parameter init (mimic nn.Linear's uniform(-1/sqrt(K), 1/sqrt(K))).
    bound = 1.0 / jnp.sqrt(jnp.float32(in_features))
    w_torch_layout = jax.random.uniform(
        k_w, (out_features, in_features), jnp.float32, -bound, bound
    )  # torch stores (out, in)
    bias = jax.random.uniform(
        k_b, (out_features,), jnp.float32, -bound, bound
    )
    weight = w_torch_layout.T  # (in_features, out_features) for the kernel

    x = jax.random.uniform(k_x, (batch, in_features), jnp.float32)

    y = linear(x, weight, bias)
    jax.block_until_ready(y)

    # Reference check against plain JAX.
    y_ref = x @ weight + bias
    assert y.shape == (batch, out_features)
    assert jnp.allclose(y, y_ref, atol=1e-5, rtol=1e-5)

    print("KERNEL_OK")
</pallas_src>

<mosaic_0001>
module attributes {stable_mosaic.version = 11 : i64} {
  func.func @_linear_kernel(%arg0: memref<10x5xf32, #tpu.memory_space<vmem>>, %arg1: memref<5x3xf32, #tpu.memory_space<vmem>>, %arg2: memref<1x3xf32, #tpu.memory_space<vmem>>, %arg3: memref<10x3xf32, #tpu.memory_space<vmem>>) attributes {dimension_semantics = [], scalar_prefetch = 0 : i64, scratch_operands = 0 : i64, tpu.core_type = #tpu.core_type<tc>} {
    %c0 = arith.constant 0 : index
    %c0_0 = arith.constant 0 : index
    %0 = vector.load %arg0[%c0, %c0_0] : memref<10x5xf32, #tpu.memory_space<vmem>>, vector<10x5xf32>
    %c0_1 = arith.constant 0 : index
    %c0_2 = arith.constant 0 : index
    %1 = vector.load %arg1[%c0_1, %c0_2] : memref<5x3xf32, #tpu.memory_space<vmem>>, vector<5x3xf32>
    %c0_3 = arith.constant 0 : index
    %c0_4 = arith.constant 0 : index
    %2 = vector.load %arg2[%c0_3, %c0_4] : memref<1x3xf32, #tpu.memory_space<vmem>>, vector<1x3xf32>
    %3 = vector.shape_cast %2 : vector<1x3xf32> to vector<1x3xf32>
    %4 = vector.broadcast %3 : vector<1x3xf32> to vector<10x3xf32>
    %5 = vector.extract_strided_slice %0 {offsets = [0, 0], sizes = [10, 1], strides = [1, 1]} : vector<10x5xf32> to vector<10x1xf32>
    %6 = vector.shape_cast %5 : vector<10x1xf32> to vector<10xf32>
    %7 = vector.shape_cast %6 : vector<10xf32> to vector<10x1xf32>
    %8 = vector.extract_strided_slice %1 {offsets = [0, 0], sizes = [1, 3], strides = [1, 1]} : vector<5x3xf32> to vector<1x3xf32>
    %9 = vector.shape_cast %8 : vector<1x3xf32> to vector<3xf32>
    %10 = vector.shape_cast %9 : vector<3xf32> to vector<1x3xf32>
    %11 = vector.broadcast %7 : vector<10x1xf32> to vector<10x3xf32>
    %12 = vector.broadcast %10 : vector<1x3xf32> to vector<10x3xf32>
    %13 = arith.mulf %11, %12 : vector<10x3xf32>
    %14 = arith.addf %4, %13 : vector<10x3xf32>
    %15 = vector.extract_strided_slice %0 {offsets = [0, 1], sizes = [10, 1], strides = [1, 1]} : vector<10x5xf32> to vector<10x1xf32>
    %16 = vector.shape_cast %15 : vector<10x1xf32> to vector<10xf32>
    %17 = vector.shape_cast %16 : vector<10xf32> to vector<10x1xf32>
    %18 = vector.extract_strided_slice %1 {offsets = [1, 0], sizes = [1, 3], strides = [1, 1]} : vector<5x3xf32> to vector<1x3xf32>
    %19 = vector.shape_cast %18 : vector<1x3xf32> to vector<3xf32>
    %20 = vector.shape_cast %19 : vector<3xf32> to vector<1x3xf32>
    %21 = vector.broadcast %17 : vector<10x1xf32> to vector<10x3xf32>
    %22 = vector.broadcast %20 : vector<1x3xf32> to vector<10x3xf32>
    %23 = arith.mulf %21, %22 : vector<10x3xf32>
    %24 = arith.addf %14, %23 : vector<10x3xf32>
    %25 = vector.extract_strided_slice %0 {offsets = [0, 2], sizes = [10, 1], strides = [1, 1]} : vector<10x5xf32> to vector<10x1xf32>
    %26 = vector.shape_cast %25 : vector<10x1xf32> to vector<10xf32>
    %27 = vector.shape_cast %26 : vector<10xf32> to vector<10x1xf32>
    %28 = vector.extract_strided_slice %1 {offsets = [2, 0], sizes = [1, 3], strides = [1, 1]} : vector<5x3xf32> to vector<1x3xf32>
    %29 = vector.shape_cast %28 : vector<1x3xf32> to vector<3xf32>
    %30 = vector.shape_cast %29 : vector<3xf32> to vector<1x3xf32>
    %31 = vector.broadcast %27 : vector<10x1xf32> to vector<10x3xf32>
    %32 = vector.broadcast %30 : vector<1x3xf32> to vector<10x3xf32>
    %33 = arith.mulf %31, %32 : vector<10x3xf32>
    %34 = arith.addf %24, %33 : vector<10x3xf32>
    %35 = vector.extract_strided_slice %0 {offsets = [0, 3], sizes = [10, 1], strides = [1, 1]} : vector<10x5xf32> to vector<10x1xf32>
    %36 = vector.shape_cast %35 : vector<10x1xf32> to vector<10xf32>
    %37 = vector.shape_cast %36 : vector<10xf32> to vector<10x1xf32>
    %38 = vector.extract_strided_slice %1 {offsets = [3, 0], sizes = [1, 3], strides = [1, 1]} : vector<5x3xf32> to vector<1x3xf32>
    %39 = vector.shape_cast %38 : vector<1x3xf32> to vector<3xf32>
    %40 = vector.shape_cast %39 : vector<3xf32> to vector<1x3xf32>
    %41 = vector.broadcast %37 : vector<10x1xf32> to vector<10x3xf32>
    %42 = vector.broadcast %40 : vector<1x3xf32> to vector<10x3xf32>
    %43 = arith.mulf %41, %42 : vector<10x3xf32>
    %44 = arith.addf %34, %43 : vector<10x3xf32>
    %45 = vector.extract_strided_slice %0 {offsets = [0, 4], sizes = [10, 1], strides = [1, 1]} : vector<10x5xf32> to vector<10x1xf32>
    %46 = vector.shape_cast %45 : vector<10x1xf32> to vector<10xf32>
    %47 = vector.shape_cast %46 : vector<10xf32> to vector<10x1xf32>
    %48 = vector.extract_strided_slice %1 {offsets = [4, 0], sizes = [1, 3], strides = [1, 1]} : vector<5x3xf32> to vector<1x3xf32>
    %49 = vector.shape_cast %48 : vector<1x3xf32> to vector<3xf32>
    %50 = vector.shape_cast %49 : vector<3xf32> to vector<1x3xf32>
    %51 = vector.broadcast %47 : vector<10x1xf32> to vector<10x3xf32>
    %52 = vector.broadcast %50 : vector<1x3xf32> to vector<10x3xf32>
    %53 = arith.mulf %51, %52 : vector<10x3xf32>
    %54 = arith.addf %44, %53 : vector<10x3xf32>
    %c0_5 = arith.constant 0 : index
    %c0_6 = arith.constant 0 : index
    %55 = vector.load %arg3[%c0_5, %c0_6] : memref<10x3xf32, #tpu.memory_space<vmem>>, vector<10x3xf32>
    tpu.vector_store %arg3[%c0_5, %c0_6], %54 {strides = array<i32>} : memref<10x3xf32, #tpu.memory_space<vmem>>, vector<10x3xf32>,
    return
  }
}

</mosaic_0001>

<bundles_post_ra>
// kernel: tpu_custom_call.1
= control target key start
LH: loop header
LB: loop body
LE: loop exit
PB: predicated region body
PF: predicated region fallthrough
CT: control target
= control target key end

     0   :  { %v128_v0 = vmov 1   ;;  %v129_v1 = vmov 0   ;;  %v130_v4 = vmov 2   ;;  %v131_v5 = vmov 3   ;;  %s171_s0 = inlined_call_operand.vmem [shape: f32[10,5], index: 0, kind: input, shape index: {}]   ;;  %s172_s1 = inlined_call_operand.vmem [shape: f32[5,3], index: 1, kind: input, shape index: {}]   ;;  %s173_s2 = inlined_call_operand.vmem [shape: f32[1,3], index: 2, kind: input, shape index: {}]   ;;  %s174_s3 = inlined_call_operand.vmem [shape: f32[10,3], index: 3, kind: output, shape index: {}]  }
   0x1   :  { %121 = vset.pattern.permute.xlu1 %v128_v0  ;;  %120 = vset.pattern.permute.xlu0 %v129_v1  ;;  %v14_v2 = vld [vmem:[%s171_s0] sm:$0xff]  ;;  %v15_v3 = vld [vmem:[%s171_s0 + $0x8] sm:$0x3]  ;;  %v132_v6 = vmov 4   ;;  %v34_v7 = vlaneseq  ;;  %vm106_vm0 = vcmask 23552   ;;  %vm108_vm1 = vcmask 17408  }
   0x2   :  { %43 = vperm.xlu1 %121, %v14_v2   ;;  %26 = vperm.xlu0 %120, %v14_v2   ;;  %v16_v12 = vld [vmem:[%s172_s1] sm:$0x1f] }
   0x3   :  { %v35_v8 = vshrl.u32 %v34_v7, 7  ;;  %v114_v20 = vld [vmem:[%s173_s2] ss:$0 sm:$0xff] }
   0x5   :  { %v36_v10 = vsub.s32 0, %v35_v8  ;;  %v52_v16 = vsub.s32 1, %v35_v8  ;;  %v68_v17 = vsub.s32 2, %v35_v8  ;;  %v84_v19 = vsub.s32 3, %v35_v8 }
   0x6   :  { %47 = vperm.xlu1 %121, %v15_v3   ;;  %31 = vperm.xlu0 %120, %v15_v3   ;;  %v100_v28 = vsub.s32 4, %v35_v8 }
   0x7   :  { %v37_v13 = vrot.slane %v16_v12, %v36_v10  ;;  %v53_v22 = vrot.slane %v16_v12, %v52_v16  ;;  %v69_v24 = vrot.slane %v16_v12, %v68_v17  ;;  %v85_v27 = vrot.slane %v16_v12, %v84_v19 }
   0x8   :  { %v101_v36 = vrot.slane %v16_v12, %v100_v28 }
   0xa   :  { %123 = vset.pattern.permute.xlu1 %v130_v4  ;;  %122 = vset.pattern.permute.xlu0 %v130_v4 }
   0xb   :  { %63 = vperm.xlu1 %123, %v15_v3   ;;  %59 = vperm.xlu0 %122, %v14_v2  }
   0xf   :  { %124 = vset.pattern.permute.xlu1 %v131_v5  ;;  %125 = vset.pattern.permute.xlu0 %v131_v5 }
  0x10   :  { %75 = vperm.xlu1 %124, %v14_v2   ;;  %79 = vperm.xlu0 %125, %v15_v3  }
  0x14   :  { %126 = vset.pattern.permute.xlu1 %v132_v6  ;;  %127 = vset.pattern.permute.xlu0 %v132_v6 }
  0x15   :  { %91 = vperm.xlu1 %126, %v14_v2  }
  0x19   :  { %95 = vperm.xlu1 %126, %v15_v3  }
  0x81   :  { %v44_v9 = vpop.permute.xlu1 %43  ;;  %v27_v11 = vpop.permute.xlu0 %26 }
  0x82   :  { %v38_v18 = vmul.f32 %v37_v13, %v27_v11  ;;  %v54_v29 = vmul.f32 %v53_v22, %v44_v9 }
  0x84   :  { %v40_v26 = vadd.f32 %v114_v20, %v38_v18 }
  0x85   :  { %v48_v14 = vpop.permute.xlu1 %47  ;;  %v32_v15 = vpop.permute.xlu0 %31 }
  0x86   :  { %v39_v23 = vmul.f32 %v37_v13, %v32_v15  ;;  %v55_v33 = vmul.f32 %v53_v22, %v48_v14  ;;  %v56_v34 = vadd.f32 %v54_v29, %v40_v26 }
  0x88   :  { %v41_v30 = vadd.f32 %v114_v20, %v39_v23 }
  0x8a   :  { %v64_v21 = vpop.permute.xlu1 %63  ;;  %v60_v25 = vpop.permute.xlu0 %59  ;;  %v57_v38 = vadd.f32 %v55_v33, %v41_v30 }
  0x8b   :  { %v70_v31 = vmul.f32 %v69_v24, %v60_v25  ;;  %v71_v39 = vmul.f32 %v69_v24, %v64_v21 }
  0x8d   :  { %v72_v40 = vadd.f32 %v70_v31, %v56_v34  ;;  %v73_v45 = vadd.f32 %v71_v39, %v57_v38 }
  0x8f   :  { %v76_v32 = vpop.permute.xlu1 %75  ;;  %v80_v37 = vpop.permute.xlu0 %79 }
  0x90   :  { %v86_v35 = vmul.f32 %v85_v27, %v76_v32  ;;  %v87_v43 = vmul.f32 %v85_v27, %v80_v37 }
  0x92   :  { %v88_v42 = vadd.f32 %v86_v35, %v72_v40  ;;  %v89_v48 = vadd.f32 %v87_v43, %v73_v45 }
  0x94   :  { %v92_v41 = vpop.permute.xlu1 %91 }
  0x95   :  { %v102_v44 = vmul.f32 %v101_v36, %v92_v41 }
  0x97   :  { %v104_v46 = vadd.f32 %v102_v44, %v88_v42 }
  0x98   :  { %v96_v47 = vpop.permute.xlu1 %95 }
  0x99   :  { %107 = vst.msk [vmem:[%s174_s3] sm:$0xff] %vm106_vm0, %v104_v46  ;;  %v103_v49 = vmul.f32 %v101_v36, %v96_v47 }
  0x9b   :  { %v105_v50 = vadd.f32 %v103_v49, %v89_v48 }
  0x9d   :  { %109 = vst.msk [vmem:[%s174_s3 + $0x8] sm:$0x3] %vm108_vm1, %v105_v50 }

</bundles_post_ra>
